<compile_context>
chip_gen: v7x
topology: tpu7x:2x2x1
jax: 0.10.0
libtpu: 0.0.40
codegen_flags: <defaults>
</compile_context>

<pallas_src>
import functools

import jax
import jax.numpy as jnp
from jax.experimental import pallas as pl
from jax.experimental.pallas import tpu as pltpu

EPS = 1e-6


def sublayer_connection_kernel(x_ref, a2_ref, b2_ref, w_ref, wb_ref, o_ref):
    x = x_ref[...].astype(jnp.float32)
    h = x.shape[-1]

    # ---- LayerNorm, matching the Annotated-Transformer module exactly ----
    # mean over last dim; std is the *unbiased* estimator (divides by N-1),
    # and eps is added to std (NOT to variance), as in the reference module.
    mean = jnp.mean(x, axis=-1, keepdims=True)
    centered = x - mean
    var = jnp.sum(centered * centered, axis=-1, keepdims=True) * (1.0 / (h - 1))
    # Exact reciprocal: the approx EUP path was outside tolerance for the test.
    inv_std = 1.0 / (jnp.sqrt(var) + EPS)
    normed = a2_ref[...] * (centered * inv_std) + b2_ref[...]

    # ---- sublayer: Linear(size, size) on the MXU ----
    # w_ref holds W^T (hidden_in, hidden_out): normed @ W^T + b.
    # Operands are cast to the weight dtype (pass bf16 weights for full MXU
    # rate on v6e/v7x); accumulation stays f32 via preferred_element_type.
    y = jnp.dot(normed.astype(w_ref.dtype), w_ref[...],
                preferred_element_type=jnp.float32) + wb_ref[...]

    # ---- residual connection ----
    # Reload x from VMEM for the residual instead of keeping the f32 copy live
    # across the matmul (shorter live ranges -> less vreg/spill pressure).
    o_ref[...] = (x_ref[...].astype(jnp.float32) + y).astype(o_ref.dtype)


@functools.partial(jax.jit, static_argnames=("tile_m",))
def sublayer_connection(x, a2, b2, w_t, wb, *, tile_m=256):
    """x: [B, S, H]; a2, b2, wb: [H]; w_t: [H, H] (already transposed)."""
    B, S, H = x.shape
    M = B * S
    x2 = x.reshape(M, H)

    # Row tile: multiple of 8 sublanes, default 256 (MXU-width on v6e/v7x),
    # clamped for tiny inputs.
    m_rounded = ((M + 7) // 8) * 8
    tm = min(tile_m, m_rounded)
    Mp = pl.cdiv(M, tm) * tm
    if Mp != M:
        # Pad rows so every grid step sees a full tile (padded rows are benign:
        # zeros -> centered == 0 -> normed == b2 -> finite y; sliced off below).
        x2 = jnp.pad(x2, ((0, Mp - M), (0, 0)))
    grid = (Mp // tm,)

    x_bytes = jnp.dtype(x.dtype).itemsize
    w_bytes = jnp.dtype(w_t.dtype).itemsize
    # Resident weight + double-buffered x/out tiles + params, with headroom.
    vmem_need = (H * H * w_bytes
                 + 2 * 2 * tm * H * x_bytes
                 + 4 * H * 4)
    vmem_limit = int(min(64 << 20, max(32 << 20, 2 * vmem_need)))

    cost = pl.CostEstimate(
        flops=2 * Mp * H * H + 8 * Mp * H,          # matmul + LN/residual elementwise
        transcendentals=2 * Mp,                     # sqrt + divide per row
        bytes_accessed=2 * Mp * H * x_bytes + H * H * w_bytes + 3 * H * 4,
    )

    out = pl.pallas_call(
        sublayer_connection_kernel,
        out_shape=jax.ShapeDtypeStruct((Mp, H), x.dtype),
        grid_spec=pltpu.PrefetchScalarGridSpec(
            num_scalar_prefetch=0,
            grid=grid,
            in_specs=[
                pl.BlockSpec((tm, H), lambda i: (i, 0)),   # x tile (pipelined)
                pl.BlockSpec((1, H), lambda i: (0, 0)),    # a_2 (resident)
                pl.BlockSpec((1, H), lambda i: (0, 0)),    # b_2 (resident)
                pl.BlockSpec((H, H), lambda i: (0, 0)),    # W^T (resident)
                pl.BlockSpec((1, H), lambda i: (0, 0)),    # bias (resident)
            ],
            out_specs=pl.BlockSpec((tm, H), lambda i: (i, 0)),
        ),
        compiler_params=pltpu.CompilerParams(
            dimension_semantics=("parallel",),             # shard rows across TCs (v7x)
            vmem_limit_bytes=vmem_limit,
        ),
        cost_estimate=cost,
    )(x2, a2.reshape(1, H), b2.reshape(1, H), w_t, wb.reshape(1, H))

    if Mp != M:
        out = out[:M]
    return out.reshape(B, S, H)


def reference(x, a2, b2, w_t, wb):
    xf = x.astype(jnp.float32)
    h = xf.shape[-1]
    mean = jnp.mean(xf, axis=-1, keepdims=True)
    var = jnp.sum((xf - mean) ** 2, axis=-1, keepdims=True) / (h - 1)
    std = jnp.sqrt(var)
    normed = a2 * (xf - mean) / (std + EPS) + b2
    y = normed @ w_t + wb
    return (xf + y).astype(x.dtype)


if __name__ == "__main__":
    B, S, H = 2, 8, 32  # batch=2, seq=8, hidden(size)=32
    # TODO(synk): with H=32 the output lane width is below 128, forcing masked
    #             partial stores; real transformer H (multiple of 128) avoids this.

    key = jax.random.PRNGKey(0)
    kx, kw, kb = jax.random.split(key, 3)

    x = jax.random.normal(kx, (B, S, H), dtype=jnp.float32)

    # LayerNorm params: as in __init__ (ones / zeros)
    a2 = jnp.ones((H,), dtype=jnp.float32)
    b2 = jnp.zeros((H,), dtype=jnp.float32)

    # Deterministic Linear(size, size) sublayer params (stored as W^T)
    w_t = jax.random.normal(kw, (H, H), dtype=jnp.float32) * 0.05
    wb = jax.random.normal(kb, (H,), dtype=jnp.float32) * 0.05

    out = sublayer_connection(x, a2, b2, w_t, wb)
    jax.block_until_ready(out)

    ref = reference(x, a2, b2, w_t, wb)
    assert jnp.allclose(out, ref, atol=1e-4, rtol=1e-4), "mismatch vs reference"

    print("KERNEL_OK")
</pallas_src>

<mosaic_0001>
module attributes {stable_mosaic.version = 11 : i64} {
  func.func @sublayer_connection_kernel(%arg0: i32, %arg1: memref<16x32xf32, #tpu.memory_space<vmem>>, %arg2: memref<1x32xf32, #tpu.memory_space<vmem>>, %arg3: memref<1x32xf32, #tpu.memory_space<vmem>>, %arg4: memref<32x32xf32, #tpu.memory_space<vmem>>, %arg5: memref<1x32xf32, #tpu.memory_space<vmem>>, %arg6: memref<16x32xf32, #tpu.memory_space<vmem>>) attributes {dimension_semantics = [#tpu.dimension_semantics<parallel>], iteration_bounds = array<i64: 1>, scalar_prefetch = 0 : i64, scratch_operands = 0 : i64, tpu.core_type = #tpu.core_type<tc>, window_params = [{transform_indices = @transform_0, window_bounds = array<i64: 16, 32>}, {pipeline_mode = #tpu.pipeline_mode<synchronous>, transform_indices = @transform_1, window_bounds = array<i64: 1, 32>}, {pipeline_mode = #tpu.pipeline_mode<synchronous>, transform_indices = @transform_2, window_bounds = array<i64: 1, 32>}, {pipeline_mode = #tpu.pipeline_mode<synchronous>, transform_indices = @transform_3, window_bounds = array<i64: 32, 32>}, {pipeline_mode = #tpu.pipeline_mode<synchronous>, transform_indices = @transform_4, window_bounds = array<i64: 1, 32>}, {transform_indices = @transform_5, window_bounds = array<i64: 16, 32>}]} {
    %c0 = arith.constant 0 : index
    %c0_0 = arith.constant 0 : index
    %0 = vector.load %arg1[%c0, %c0_0] : memref<16x32xf32, #tpu.memory_space<vmem>>, vector<16x32xf32>
    %cst = arith.constant dense<0.000000e+00> : vector<16xf32>
    %1 = vector.multi_reduction <add>, %0, %cst [1] : vector<16x32xf32> to vector<16xf32>
    %2 = vector.shape_cast %1 : vector<16xf32> to vector<16x1xf32>
    %cst_1 = arith.constant 3.200000e+01 : f32
    %3 = vector.broadcast %cst_1 : f32 to vector<16x1xf32>
    %4 = arith.divf %2, %3 : vector<16x1xf32>
    %5 = vector.broadcast %4 : vector<16x1xf32> to vector<16x32xf32>
    %6 = arith.subf %0, %5 : vector<16x32xf32>
    %7 = arith.mulf %6, %6 : vector<16x32xf32>
    %cst_2 = arith.constant dense<0.000000e+00> : vector<16xf32>
    %8 = vector.multi_reduction <add>, %7, %cst_2 [1] : vector<16x32xf32> to vector<16xf32>
    %9 = vector.shape_cast %8 : vector<16xf32> to vector<16x1xf32>
    %cst_3 = arith.constant 0.0322580636 : f32
    %10 = vector.broadcast %cst_3 : f32 to vector<16x1xf32>
    %11 = arith.mulf %9, %10 : vector<16x1xf32>
    %12 = math.sqrt %11 : vector<16x1xf32>
    %cst_4 = arith.constant 9.99999997E-7 : f32
    %13 = vector.broadcast %cst_4 : f32 to vector<16x1xf32>
    %14 = arith.addf %12, %13 : vector<16x1xf32>
    %cst_5 = arith.constant 1.000000e+00 : f32
    %15 = vector.broadcast %cst_5 : f32 to vector<16x1xf32>
    %16 = arith.divf %15, %14 : vector<16x1xf32>
    %c0_6 = arith.constant 0 : index
    %c0_7 = arith.constant 0 : index
    %17 = vector.load %arg2[%c0_6, %c0_7] : memref<1x32xf32, #tpu.memory_space<vmem>>, vector<1x32xf32>
    %18 = vector.broadcast %16 : vector<16x1xf32> to vector<16x32xf32>
    %19 = arith.mulf %6, %18 : vector<16x32xf32>
    %20 = vector.broadcast %17 : vector<1x32xf32> to vector<16x32xf32>
    %21 = arith.mulf %20, %19 : vector<16x32xf32>
    %c0_8 = arith.constant 0 : index
    %c0_9 = arith.constant 0 : index
    %22 = vector.load %arg3[%c0_8, %c0_9] : memref<1x32xf32, #tpu.memory_space<vmem>>, vector<1x32xf32>
    %23 = vector.broadcast %22 : vector<1x32xf32> to vector<16x32xf32>
    %24 = arith.addf %21, %23 : vector<16x32xf32>
    %c0_10 = arith.constant 0 : index
    %c0_11 = arith.constant 0 : index
    %25 = vector.load %arg4[%c0_10, %c0_11] : memref<32x32xf32, #tpu.memory_space<vmem>>, vector<32x32xf32>
    %cst_12 = arith.constant dense<0.000000e+00> : vector<16x32xf32>
    %26 = tpu.matmul %24, %25, %cst_12 {dimension_numbers = #tpu.dot_dimension_numbers<[1], [0], [0], [1], [0, 0, 1, 1], [], []>} : vector<16x32xf32>, vector<32x32xf32>, vector<16x32xf32> -> vector<16x32xf32>
    %c0_13 = arith.constant 0 : index
    %c0_14 = arith.constant 0 : index
    %27 = vector.load %arg5[%c0_13, %c0_14] : memref<1x32xf32, #tpu.memory_space<vmem>>, vector<1x32xf32>
    %28 = vector.broadcast %27 : vector<1x32xf32> to vector<16x32xf32>
    %29 = arith.addf %26, %28 : vector<16x32xf32>
    %c0_15 = arith.constant 0 : index
    %c0_16 = arith.constant 0 : index
    %30 = vector.load %arg1[%c0_15, %c0_16] : memref<16x32xf32, #tpu.memory_space<vmem>>, vector<16x32xf32>
    %31 = arith.addf %30, %29 : vector<16x32xf32>
    %c0_17 = arith.constant 0 : index
    %c0_18 = arith.constant 0 : index
    %32 = vector.load %arg6[%c0_17, %c0_18] : memref<16x32xf32, #tpu.memory_space<vmem>>, vector<16x32xf32>
    tpu.vector_store %arg6[%c0_17, %c0_18], %31 {strides = array<i32>} : memref<16x32xf32, #tpu.memory_space<vmem>>, vector<16x32xf32>,
    return
  }
  func.func @transform_0(%arg0: i32) -> (i32, i32) {
    %c0_i32 = arith.constant 0 : i32
    %c0_i32_0 = arith.constant 0 : i32
    return %arg0, %c0_i32 : i32, i32
  }
  func.func @transform_1(%arg0: i32) -> (i32, i32) {
    %c0_i32 = arith.constant 0 : i32
    %c0_i32_0 = arith.constant 0 : i32
    %c0_i32_1 = arith.constant 0 : i32
    return %c0_i32, %c0_i32_0 : i32, i32
  }
  func.func @transform_2(%arg0: i32) -> (i32, i32) {
    %c0_i32 = arith.constant 0 : i32
    %c0_i32_0 = arith.constant 0 : i32
    %c0_i32_1 = arith.constant 0 : i32
    return %c0_i32, %c0_i32_0 : i32, i32
  }
  func.func @transform_3(%arg0: i32) -> (i32, i32) {
    %c0_i32 = arith.constant 0 : i32
    %c0_i32_0 = arith.constant 0 : i32
    %c0_i32_1 = arith.constant 0 : i32
    return %c0_i32, %c0_i32_0 : i32, i32
  }
  func.func @transform_4(%arg0: i32) -> (i32, i32) {
    %c0_i32 = arith.constant 0 : i32
    %c0_i32_0 = arith.constant 0 : i32
    %c0_i32_1 = arith.constant 0 : i32
    return %c0_i32, %c0_i32_0 : i32, i32
  }
  func.func @transform_5(%arg0: i32) -> (i32, i32) {
    %c0_i32 = arith.constant 0 : i32
    %c0_i32_0 = arith.constant 0 : i32
    return %arg0, %c0_i32 : i32, i32
  }
}

</mosaic_0001>

<bundles_post_ra>
// kernel: sublayer_connection.1
= control target key start
LH: loop header
LB: loop body
LE: loop exit
PB: predicated region body
PF: predicated region fallthrough
CT: control target
= control target key end

     0   :  { %10 = vsyncpa [#allocation3], 0  ;;  %s449_s0 = inlined_call_operand.hbm [shape: f32[16,32], index: 0, kind: input, shape index: {}]   ;;  %s450_s1 = inlined_call_operand.vmem [shape: f32[1,32], index: 1, kind: input, shape index: {}]   ;;  %s451_s2 = inlined_call_operand.vmem [shape: f32[1,32], index: 2, kind: input, shape index: {}]   ;;  %s452_s3 = inlined_call_operand.hbm [shape: f32[32,32], index: 3, kind: input, shape index: {}]   ;;  %s453_s4 = inlined_call_operand.vmem [shape: f32[1,32], index: 4, kind: input, shape index: {}]   ;;  %s454_s5 = inlined_call_operand.hbm [shape: f32[16,32], index: 5, kind: output, shape index: {}]  }
   0x1   :  { %11 = vsyncpa [#allocation6], 0 }
   0x2   :  { %12 = vsyncpa [#allocation4], 0  ;;  %s342_s18 = smov [#allocation2]   ;;  %s270_s22 = scalar_lea.hbm %s449_s0, 256 }
   0x3   :  { %s18_s19 = sshll.u32 %s342_s18, 4  ;;  %p271_p0 = scmp.ne.s32.totalorder %s449_s0, %s270_s22  ;;  %s19_s19 = int_to_ptr.vmem [resolvable:$true] %s18_s19 }
   0x4   :  { %p274_p1 = scmp.lt.u32.totalorder %s270_s22, %s449_s0 }
   0x6   :  { %p276_p2 = pnand %p274_p1, %p271_p0 }
   0x8   :  { %279 = shalt.err (!%p276_p2)
}
   0x9   :  { %s280_s27 = scalar_lea.vmem %s19_s19, 256  ;;  %p285_p4 = scmp.lt.s32.totalorder %s19_s19, %s19_s19 }
   0xa   :  { %p281_p3 = scmp.ne.s32.totalorder %s19_s19, %s280_s27  ;;  %p286_p5 = scmp.lt.s32.totalorder %s280_s27, %s280_s27 }
   0xc   :  { %p287_p6 = por %p286_p5, %p285_p4 }
   0xe   :  { %p288_p7 = pnand %p287_p6, %p281_p3 }
  0x10   :  { %291 = shalt.err (!%p288_p7)
}
  0x11   :  { %s343_s28 = smov 128   ;;  %s344_s29 = smov 8  }
  0x12   :  { %24 = dma.hbm_to_vmem [thread:$0]  %s449_s0, 256, %s19_s19, [#allocation3], %s343_s28, %s343_s28, %s344_s29  }
  0x13   :  { %s345_s7 = smov [#allocation5]   ;;  %s292_s11 = scalar_lea.hbm %s452_s3, 512 }
  0x14   :  { %s34_s8 = sshll.u32 %s345_s7, 4  ;;  %p293_p8 = scmp.ne.s32.totalorder %s452_s3, %s292_s11  ;;  %s35_s8 = int_to_ptr.vmem [resolvable:$true] %s34_s8 }
  0x15   :  { %p296_p9 = scmp.lt.u32.totalorder %s292_s11, %s452_s3 }
  0x17   :  { %p298_p10 = pnand %p296_p9, %p293_p8 }
  0x19   :  { %301 = shalt.err (!%p298_p10)
}
  0x1a   :  { %s302_s16 = scalar_lea.vmem %s35_s8, 512  ;;  %p307_p12 = scmp.lt.s32.totalorder %s35_s8, %s35_s8 }
  0x1b   :  { %p303_p11 = scmp.ne.s32.totalorder %s35_s8, %s302_s16  ;;  %p308_p13 = scmp.lt.s32.totalorder %s302_s16, %s302_s16 }
  0x1d   :  { %p309_p0 = por %p308_p13, %p307_p12 }
  0x1f   :  { %p310_p1 = pnand %p309_p0, %p303_p11 }
  0x21   :  { %313 = shalt.err (!%p310_p1)
}
  0x22   :  { %40 = dma.hbm_to_vmem [thread:$0]  %s452_s3, 512, %s35_s8, [#allocation6], %s343_s28, %s343_s28, %s344_s29  }
  0x23   :  { %336 = dma.done.wait [#allocation3], 256  }
  0x24   :  { %337 = vsyncadd [#allocation3], 4294967040 }
  0x25   :  { %338 = dma.done.wait [#allocation6], 512  }
  0x26   :  { %339 = vsyncadd [#allocation6], 4294966784  ;;  %vm51_vm0 = vcmask 261120   ;;  %v407_v0 = vld [vmem:[#allocation2] sm:$0xff]  ;;  %v409_v1 = vld [vmem:[#allocation2 + $0x8] sm:$0xff] }
  0x27   :  { %v52_v2 = vsel %vm51_vm0, %v407_v0, 0.0  ;;  %v55_v3 = vsel %vm51_vm0, %v409_v1, 0.0  ;;  %v113_v14 = vld [vmem:[#allocation5] sm:$0xff]  ;;  %v114_v15 = vld [vmem:[#allocation5 + $0x8] sm:$0xff]  ;;  %v115_v16 = vld [vmem:[#allocation5 + $0x10] sm:$0xff] }
  0x28   :  { %53 = vadd.xlane.f32.xlu0 %v52_v2  ;;  %v249_v17 = vpack.c.bf16 %v114_v15, %v113_v14  ;;  %v116_v18 = vld [vmem:[#allocation5 + $0x18] sm:$0xff]  ;;  %v227_v37 = vld [vmem:[%s450_s1] ss:$0 sm:$0xff]  ;;  %s346_s1 = smov [#allocation7]  }
  0x29   :  { %v253_v19 = vpack.c.bf16 %v116_v18, %v115_v16  ;;  %v228_v39 = vld [vmem:[%s451_s2] ss:$0 sm:$0xff]  ;;  %s214_s23 = sshll.u32 %s346_s1, 4  ;;  %s215_s23 = int_to_ptr.vmem [resolvable:$true] %s214_s23 }
  0x2a   :  { %250 = vmatprep.subr.bf16.mxu0 %v249_v17  ;;  %v229_v46 = vld [vmem:[%s453_s4] ss:$0 sm:$0xff]  ;;  %s314_s2 = scalar_lea.vmem %s215_s23, 256  ;;  %p319_p3 = scmp.lt.s32.totalorder %s215_s23, %s215_s23 }
  0x2b   :  { %252 = vmatpush3.bf16.msra.mxu0 %v249_v17  ;;  %p315_p2 = scmp.ne.s32.totalorder %s215_s23, %s314_s2  ;;  %p320_p4 = scmp.lt.s32.totalorder %s314_s2, %s314_s2 }
  0x2c   :  { %56 = vadd.xlane.f32.xlu0 %v55_v3  ;;  %254 = vmatprep.subr.bf16.mxu0 %v253_v19 }
  0x2d   :  { %p321_p5 = por %p320_p4, %p319_p3 }
  0x2f   :  { %256 = vmatpush3.bf16.msra.mxu0 %v253_v19  ;;  %p322_p6 = pnand %p321_p5, %p315_p2 }
  0xb5   :  { %v54_v4 = vpop.xlane.xlu0 %53 }
  0xb6   :  { %v59_v5 = vmul.f32 0.03125, %v54_v4 }
  0xb8   :  { %v61_v6 = vsub.f32 %v407_v0, %v59_v5 }
  0xb9   :  { %v57_v7 = vpop.xlane.xlu0 %56 }
  0xba   :  { %v60_v8 = vmul.f32 0.03125, %v57_v7  ;;  %v63_v9 = vmul.f32 %v61_v6, %v61_v6 }
  0xbc   :  { %v62_v10 = vsub.f32 %v409_v1, %v60_v8  ;;  %v65_v11 = vsel %vm51_vm0, %v63_v9, 0.0 }
  0xbd   :  { %66 = vadd.xlane.f32.xlu1 %v65_v11 }
  0xbe   :  { %v64_v12 = vmul.f32 %v62_v10, %v62_v10 }
  0xc0   :  { %v68_v13 = vsel %vm51_vm0, %v64_v12, 0.0 }
  0xc1   :  { %69 = vadd.xlane.f32.xlu1 %v68_v13 }
 0x14a   :  { %v67_v20 = vpop.xlane.xlu1 %66 }
 0x14b   :  { %v71_v21 = vmul.f32 0.032258064, %v67_v20 }
 0x14d   :  { %262 = vrsqrt.f32 %v71_v21  ;;  %vm75_vm1 = vcmp.eq.f32.partialorder %v71_v21, inf  ;;  %v78_v26 = vand.u32 2147483648, %v71_v21  ;;  %vm77_vm2 = vcmp.eq.f32.partialorder %v71_v21, 0.0 }
 0x14e   :  { %v70_v22 = vpop.xlane.xlu1 %69 }
 0x14f   :  { %v72_v23 = vmul.f32 0.032258064, %v70_v22 }
 0x151   :  { %264 = vrsqrt.f32 %v72_v23  ;;  %vm82_vm3 = vcmp.eq.f32.partialorder %v72_v23, inf  ;;  %v85_v32 = vand.u32 2147483648, %v72_v23  ;;  %vm84_vm4 = vcmp.eq.f32.partialorder %v72_v23, 0.0 }
 0x157   :  { %v263_v24 = vpop.eup %262 }
 0x158   :  { %v74_v25 = vmul.f32 %v263_v24, %v71_v21 }
 0x15a   :  { %v76_v27 = vsel %vm75_vm1, %v71_v21, %v74_v25 }
 0x15b   :  { %v265_v28 = vpop.eup %264  ;;  %v79_v29 = vsel %vm77_vm2, %v78_v26, %v76_v27 }
 0x15c   :  { %v81_v30 = vmul.f32 %v265_v28, %v72_v23  ;;  %v87_v31 = vadd.f32 1e-06, %v79_v29 }
 0x15e   :  { %v83_v33 = vsel %vm82_vm3, %v72_v23, %v81_v30  ;;  %266 = vrcp.f32 %v87_v31 }
 0x15f   :  { %v86_v34 = vsel %vm84_vm4, %v85_v32, %v83_v33 }
 0x160   :  { %v88_v35 = vadd.f32 1e-06, %v86_v34 }
 0x162   :  { %268 = vrcp.f32 %v88_v35 }
 0x168   :  { %v267_v36 = vpop.eup %266 }
 0x169   :  { %v94_v38 = vmul.f32 %v267_v36, %v61_v6 }
 0x16b   :  { %v102_v40 = vmul.f32 %v227_v37, %v94_v38 }
 0x16c   :  { %v269_v41 = vpop.eup %268 }
 0x16d   :  { %v95_v42 = vmul.f32 %v269_v41, %v62_v10  ;;  %v111_v43 = vadd.f32 %v228_v39, %v102_v40 }
 0x16f   :  { %v103_v44 = vmul.f32 %v227_v37, %v95_v42  ;;  %246 = vmatprep.mubr.msk.f32.mxu0 %vm51_vm0, %v111_v43 }
 0x171   :  { %v112_v45 = vadd.f32 %v228_v39, %v103_v44 }
 0x173   :  { %247 = vmatmul.mubr.msk.f32.vlgmr.msra.gmra.mrb[0].mxu0 %vm51_vm0, %v112_v45 }
 0x246   :  { %v248_v47 = vpop.f32.mrb[0].mxu0 }
 0x247   :  { %v202_v48 = vadd.f32 %v248_v47, %v229_v46  ;;  %v196_v49 = vpop.f32.mrb[1].mxu0 }
 0x248   :  { %v197_v50 = vadd.f32 %v229_v46, %v196_v49 }
 0x249   :  { %v206_v51 = vadd.f32 %v202_v48, %v409_v1 }
 0x24a   :  { %v205_v52 = vadd.f32 %v197_v50, %v407_v0 }
 0x24b   :  { %208 = vst.msk [vmem:[#allocation7 + $0x8] sm:$0xff] %vm51_vm0, %v206_v51 }
 0x24c   :  { %207 = vst.msk [vmem:[#allocation7] sm:$0xff] %vm51_vm0, %v205_v52 }
 0x24d   :  { %325 = shalt.err (!%p322_p6)
}
 0x24e   :  { %s326_s25 = scalar_lea.hbm %s454_s5, 256 }
 0x24f   :  { %p327_p7 = scmp.ne.s32.totalorder %s454_s5, %s326_s25  ;;  %p330_p8 = scmp.lt.u32.totalorder %s326_s25, %s454_s5 }
 0x251   :  { %p332_p9 = pnand %p330_p8, %p327_p7 }
 0x253   :  { %335 = shalt.err (!%p332_p9)
}
 0x254   :  { %220 = dma.vmem_to_hbm [thread:$0]  %s215_s23, 256, %s454_s5, [#allocation4], %s343_s28, %s343_s28, %s344_s29  }
 0x255   :  { %340 = dma.done.wait [#allocation4], 256  }
 0x256   :  { %341 = vsyncadd [#allocation4], 4294967040 }
 0x257   :  { %224 = vsyncpa [#allocation3], 1 }
 0x258   :  { %225 = vsyncpa [#allocation6], 1 }
 0x259   :  { %226 = vsyncpa [#allocation4], 1 }

</bundles_post_ra>
